<compile_context>
chip_gen: v7x
topology: tpu7x:2x2x1
jax: 0.10.0
libtpu: 0.0.40
codegen_flags: <defaults>
</compile_context>

<pallas_src>
import functools
import math

import numpy as np

import jax
import jax.numpy as jnp
from jax.experimental import pallas as pl
from jax.experimental.pallas import tpu as pltpu


def _round_up(x, m):
    return ((x + m - 1) // m) * m


def _epilogue_dtype():
    """bf16 epilogue on v6e/v7x (bf16 VPU/EUP); f32 on v5e and older / unknown."""
    try:
        kind = jax.devices()[0].device_kind.lower()
    except Exception:  # pragma: no cover - conservative fallback
        return jnp.float32
    if "v6" in kind or "v7" in kind:
        return jnp.bfloat16
    return jnp.float32


# ---------------------------------------------------------------------------
# Fused kernel
# ---------------------------------------------------------------------------
def _cove_fused_kernel(x_ref, w1_ref, b1_ref, w2_ref, b2_ref, out_ref,
                       *, hp1, hp2, compute_dtype):
    """Two stacked bidirectional seq_len==1 LSTM layers, fused, one batch tile.

    x_ref  : (TILE_B, D1)        bf16/f32 input tile
    w1_ref : (D1, 3*Hp1)         bf16  lane slabs = [i_fwd|i_bwd|pad][g..][o..]
    b1_ref : (1, 3*Hp1)          f32   (b_ih + b_hh), same lane layout
    w2_ref : (Hp1, 3*Hp2)        bf16  (rows beyond 2*H1 are zero)
    b2_ref : (1, 3*Hp2)          f32
    out_ref: (TILE_B, Hp1+Hp2)   lanes [0:Hp1) = layer-1 h, [Hp1:) = layer-2 h
    """

    def bidir_cell(x_bf16, w_ref, b_ref, hp):
        # One wide MXU matmul yields the i/g/o gates of BOTH directions.
        z = jnp.dot(x_bf16, w_ref[...], preferred_element_type=jnp.float32)
        z = (z + b_ref[...]).astype(compute_dtype)
        gi = z[:, 0 * hp:1 * hp]     # 128-aligned slab starts
        gg = z[:, 1 * hp:2 * hp]
        go = z[:, 2 * hp:3 * hp]
        # Zero initial state: f * c0 == 0, so c = sigmoid(i) * tanh(g).
        c = jax.nn.sigmoid(gi) * jnp.tanh(gg)
        return jax.nn.sigmoid(go) * jnp.tanh(c)   # (TILE_B, Hp) = [h_fwd|h_bwd|0]

    x = x_ref[...]
    if x.dtype != jnp.bfloat16:
        x = x.astype(jnp.bfloat16)

    h_l1 = bidir_cell(x, w1_ref, b1_ref, hp1)                       # (TILE_B, Hp1)
    out_ref[:, :hp1] = h_l1.astype(out_ref.dtype)                   # lane-dense store
    h_l2 = bidir_cell(h_l1.astype(jnp.bfloat16), w2_ref, b2_ref, hp2)
    out_ref[:, hp1:] = h_l2.astype(out_ref.dtype)                   # lane-dense store


def _pick_tile_b(batch, act_row_bytes, budget_bytes=24 << 20, preferred=256):
    """Batch tile: multiple of 8 sublanes, <= preferred, fits the VMEM budget."""
    tb = min(preferred, _round_up(batch, 8))
    while tb > 8 and 2 * tb * act_row_bytes > budget_bytes:   # 2x = double buffer
        tb //= 2
    return max(8, _round_up(tb, 8))


def cove_forward_pallas(x, w1, b1, w2, b2, *, h1, h2, out_dtype=jnp.float32):
    """Fused forward.  Returns (out_l1, out_l2) shaped (1, B, 2*h1) / (1, B, 2*h2)."""
    B, d1 = x.shape
    hp1 = w1.shape[1] // 3
    hp2 = w2.shape[1] // 3
    assert w1.shape[0] == d1, "layer-1 packed weight must match input width"
    assert w2.shape[0] == hp1, "layer-2 packed weight must match padded layer-1 output"

    compute_dtype = _epilogue_dtype()

    x_bytes = np.dtype(x.dtype).itemsize
    out_bytes = np.dtype(out_dtype).itemsize
    act_row_bytes = d1 * x_bytes + (hp1 + hp2) * out_bytes
    tile_b = _pick_tile_b(B, act_row_bytes)

    b_pad = pl.cdiv(B, tile_b) * tile_b
    if b_pad != B:
        x = jnp.pad(x, ((0, b_pad - B), (0, 0)))
    n_tiles = b_pad // tile_b

    weight_bytes = (w1.size * np.dtype(w1.dtype).itemsize
                    + w2.size * np.dtype(w2.dtype).itemsize
                    + (b1.size + b2.size) * 4)
    act_bytes = 2 * tile_b * act_row_bytes                      # double-buffered tiles
    vmem_limit = int(min(max(weight_bytes + 2 * act_bytes + (4 << 20), 16 << 20),
                         48 << 20))

    kernel = functools.partial(_cove_fused_kernel, hp1=hp1, hp2=hp2,
                               compute_dtype=compute_dtype)

    out = pl.pallas_call(
        kernel,
        out_shape=jax.ShapeDtypeStruct((b_pad, hp1 + hp2), out_dtype),
        grid_spec=pltpu.PrefetchScalarGridSpec(
            num_scalar_prefetch=0,
            grid=(n_tiles,),
            in_specs=[
                pl.BlockSpec((tile_b, d1), lambda i: (i, 0)),     # streamed activations
                pl.BlockSpec(w1.shape, lambda i: (0, 0)),         # VMEM-resident weights
                pl.BlockSpec(b1.shape, lambda i: (0, 0)),
                pl.BlockSpec(w2.shape, lambda i: (0, 0)),
                pl.BlockSpec(b2.shape, lambda i: (0, 0)),
            ],
            out_specs=pl.BlockSpec((tile_b, hp1 + hp2), lambda i: (i, 0)),
        ),
        compiler_params=pltpu.CompilerParams(
            dimension_semantics=("parallel",),
            vmem_limit_bytes=vmem_limit,
        ),
    )(x, w1, b1, w2, b2)

    out1 = out[:B, :2 * h1]
    out2 = out[:B, hp1:hp1 + 2 * h2]
    # Add back the seq_len == 1 dimension (PyTorch LSTM output is (1, B, 2H)).
    return out1[None, :, :], out2[None, :, :]


# ---------------------------------------------------------------------------
# Parameter synthesis / packing
# ---------------------------------------------------------------------------
def _init_torch_lstm_dir(key, d_in, hidden):
    """PyTorch-style params for one LSTM direction (W_hh skipped: h0 == 0)."""
    k_wih, k_bih, k_bhh = jax.random.split(key, 3)
    bound = 1.0 / math.sqrt(hidden)
    w_ih = jax.random.uniform(k_wih, (4 * hidden, d_in), jnp.float32, -bound, bound)
    b_ih = jax.random.uniform(k_bih, (4 * hidden,), jnp.float32, -bound, bound)
    b_hh = jax.random.uniform(k_bhh, (4 * hidden,), jnp.float32, -bound, bound)
    return w_ih, b_ih, b_hh


def _pack_bidir_layer(fwd, bwd, hidden, d_in, d_in_padded, w_dtype=jnp.bfloat16):
    """Pack i/g/o gates of both directions into (d_in_padded, 3*Hp) bf16 + (1, 3*Hp) f32.

    Hp = round_up(2*hidden, 128).  Lane layout per 128-aligned slab:
        [gate_fwd (H) | gate_bwd (H) | zero pad], slabs ordered i, g, o.
    The forget gate is dropped (it only multiplies c0 == 0); padded lanes and
    padded rows are zero, so they contribute exactly 0 downstream.
    """
    hp = _round_up(2 * hidden, 128)
    w = jnp.zeros((d_in_padded, 3 * hp), jnp.float32)
    b = jnp.zeros((1, 3 * hp), jnp.float32)

    (wf, bf_ih, bf_hh) = fwd
    (wb, bb_ih, bb_hh) = bwd
    used_gates = (0, 2, 3)          # i, g, o in PyTorch order (i, f, g, o)
    for slab, k in enumerate(used_gates):
        off = slab * hp
        wg_f = wf[k * hidden:(k + 1) * hidden, :].T      # (d_in, H)
        wg_b = wb[k * hidden:(k + 1) * hidden, :].T
        w = w.at[:d_in, off:off + hidden].set(wg_f)
        w = w.at[:d_in, off + hidden:off + 2 * hidden].set(wg_b)
        b = b.at[0, off:off + hidden].set((bf_ih + bf_hh)[k * hidden:(k + 1) * hidden])
        b = b.at[0, off + hidden:off + 2 * hidden].set(
            (bb_ih + bb_hh)[k * hidden:(k + 1) * hidden])
    return w.astype(w_dtype), b


class GermanEnglishCoVePallas:
    """Pallas re-implementation of GermanEnglishCoVe.forward (seq_len == 1)."""

    def __init__(self, config, key):
        self.input_size = int(config["input_size"])
        self.hidden_size = int(config["hidden_size"])
        self.second_input_size = int(config["second_input_size"])
        self.second_hidden_size = int(config["second_hidden_size"])
        self.dropout = float(config["dropout"])  # unused in forward (matches PyTorch)
        # The fused kernel feeds layer-1 output straight into layer 2.
        assert self.second_input_size == 2 * self.hidden_size, (
            "second_input_size must equal 2 * hidden_size")
        self.hp1 = _round_up(2 * self.hidden_size, 128)
        self.hp2 = _round_up(2 * self.second_hidden_size, 128)
        # TODO(synk): weights are synthesized deterministically instead of
        # loading the `cove_model_path` checkpoint (torch.load not available).
        k1f, k1b, k2f, k2b = jax.random.split(key, 4)
        self._raw_l1 = (_init_torch_lstm_dir(k1f, self.input_size, self.hidden_size),
                        _init_torch_lstm_dir(k1b, self.input_size, self.hidden_size))
        self._raw_l2 = (_init_torch_lstm_dir(k2f, self.second_input_size,
                                             self.second_hidden_size),
                        _init_torch_lstm_dir(k2b, self.second_input_size,
                                             self.second_hidden_size))
        self.w1, self.b1 = _pack_bidir_layer(*self._raw_l1, self.hidden_size,
                                             self.input_size, self.input_size)
        # Layer-2 rows are padded to Hp1 so it consumes the padded layer-1 output.
        self.w2, self.b2 = _pack_bidir_layer(*self._raw_l2, self.second_hidden_size,
                                             self.second_input_size, self.hp1)

    def __call__(self, x):
        # x: (B, input_size)  ->  ((1, B, 2*H1), (1, B, 2*H2))
        # NOTE: only valid for seq_len == 1 with zero initial (h0, c0), which is
        # exactly what GermanEnglishCoVe.forward does via x.view(1, B, D).
        return cove_forward_pallas(x, self.w1, self.b1, self.w2, self.b2,
                                   h1=self.hidden_size, h2=self.second_hidden_size)


# ---------------------------------------------------------------------------
# Pure-JAX f32 reference (module semantics) for sanity checking
# ---------------------------------------------------------------------------
def _lstm_dir_ref_f32(x, w_ih, b_ih, b_hh, hidden):
    gates = x @ w_ih.T + (b_ih + b_hh)
    i = gates[:, 0 * hidden:1 * hidden]
    g = gates[:, 2 * hidden:3 * hidden]
    o = gates[:, 3 * hidden:4 * hidden]
    c = jax.nn.sigmoid(i) * jnp.tanh(g)
    return jax.nn.sigmoid(o) * jnp.tanh(c)


def _bidir_ref_f32(x, raw_fwd, raw_bwd, hidden):
    return jnp.concatenate(
        [_lstm_dir_ref_f32(x, *raw_fwd, hidden),
         _lstm_dir_ref_f32(x, *raw_bwd, hidden)], axis=-1)[None]


if __name__ == "__main__":
    key = jax.random.PRNGKey(0)
    k_params, k_x = jax.random.split(key)

    config = {
        "input_size": 32,
        "hidden_size": 32,
        "second_input_size": 64,    # = 2 * hidden_size (output of layer 1)
        "second_hidden_size": 32,
        "dropout": 0.0,
        "cove_model_path": None,    # unused; weights are synthesized
    }

    model = GermanEnglishCoVePallas(config, k_params)

    B = 8
    x_f32 = jax.random.normal(k_x, (B, config["input_size"]), dtype=jnp.float32)
    # bf16 activations at the kernel boundary (halves the streamed-x HBM traffic).
    x = x_f32.astype(jnp.bfloat16)

    out_l1, out_l2 = model(x)
    out_l1 = jax.block_until_ready(out_l1)
    out_l2 = jax.block_until_ready(out_l2)

    assert out_l1.shape == (1, B, 2 * config["hidden_size"])
    assert out_l2.shape == (1, B, 2 * config["second_hidden_size"])
    assert out_l1.dtype == jnp.float32 and out_l2.dtype == jnp.float32

    # Sanity check vs pure-f32 reference of the original module math (same
    # bf16-rounded input so only kernel-internal error is measured).  Tolerance
    # is relaxed because the kernel uses bf16 weights / matmul inputs (f32 MXU
    # accumulation) and a bf16 epilogue on v6e/v7x.
    x_ref = x.astype(jnp.float32)
    ref_l1 = _bidir_ref_f32(x_ref, *model._raw_l1, config["hidden_size"])
    ref_l2 = _bidir_ref_f32(ref_l1[0], *model._raw_l2, config["second_hidden_size"])
    assert jnp.allclose(out_l1, ref_l1, atol=7.5e-2, rtol=7.5e-2), (
        float(jnp.max(jnp.abs(out_l1 - ref_l1))))
    assert jnp.allclose(out_l2, ref_l2, atol=7.5e-2, rtol=7.5e-2), (
        float(jnp.max(jnp.abs(out_l2 - ref_l2))))

    print("KERNEL_OK")
</pallas_src>

<mosaic_0001>
module attributes {stable_mosaic.version = 11 : i64} {
  func.func @_cove_fused_kernel(%arg0: i32, %arg1: memref<8x32xbf16, #tpu.memory_space<vmem>>, %arg2: memref<32x384xbf16, #tpu.memory_space<vmem>>, %arg3: memref<1x384xf32, #tpu.memory_space<vmem>>, %arg4: memref<128x384xbf16, #tpu.memory_space<vmem>>, %arg5: memref<1x384xf32, #tpu.memory_space<vmem>>, %arg6: memref<8x256xf32, #tpu.memory_space<vmem>>) attributes {dimension_semantics = [#tpu.dimension_semantics<parallel>], iteration_bounds = array<i64: 1>, scalar_prefetch = 0 : i64, scratch_operands = 0 : i64, tpu.core_type = #tpu.core_type<tc>, window_params = [{transform_indices = @transform_0, window_bounds = array<i64: 8, 32>}, {pipeline_mode = #tpu.pipeline_mode<synchronous>, transform_indices = @transform_1, window_bounds = array<i64: 32, 384>}, {pipeline_mode = #tpu.pipeline_mode<synchronous>, transform_indices = @transform_2, window_bounds = array<i64: 1, 384>}, {pipeline_mode = #tpu.pipeline_mode<synchronous>, transform_indices = @transform_3, window_bounds = array<i64: 128, 384>}, {pipeline_mode = #tpu.pipeline_mode<synchronous>, transform_indices = @transform_4, window_bounds = array<i64: 1, 384>}, {transform_indices = @transform_5, window_bounds = array<i64: 8, 256>}]} {
    %c0 = arith.constant 0 : index
    %c0_0 = arith.constant 0 : index
    %0 = vector.load %arg1[%c0, %c0_0] : memref<8x32xbf16, #tpu.memory_space<vmem>>, vector<8x32xbf16>
    %c0_1 = arith.constant 0 : index
    %c0_2 = arith.constant 0 : index
    %1 = vector.load %arg2[%c0_1, %c0_2] : memref<32x384xbf16, #tpu.memory_space<vmem>>, vector<32x384xbf16>
    %cst = arith.constant dense<0.000000e+00> : vector<8x384xf32>
    %2 = tpu.matmul %0, %1, %cst {dimension_numbers = #tpu.dot_dimension_numbers<[1], [0], [0], [1], [0, 0, 1, 1], [], []>} : vector<8x32xbf16>, vector<32x384xbf16>, vector<8x384xf32> -> vector<8x384xf32>
    %c0_3 = arith.constant 0 : index
    %c0_4 = arith.constant 0 : index
    %3 = vector.load %arg3[%c0_3, %c0_4] : memref<1x384xf32, #tpu.memory_space<vmem>>, vector<1x384xf32>
    %4 = vector.broadcast %3 : vector<1x384xf32> to vector<8x384xf32>
    %5 = arith.addf %2, %4 : vector<8x384xf32>
    %6 = vector.extract_strided_slice %5 {offsets = [0, 0], sizes = [8, 128], strides = [1, 1]} : vector<8x384xf32> to vector<8x128xf32>
    %7 = vector.extract_strided_slice %5 {offsets = [0, 128], sizes = [8, 128], strides = [1, 1]} : vector<8x384xf32> to vector<8x128xf32>
    %8 = vector.extract_strided_slice %5 {offsets = [0, 256], sizes = [8, 128], strides = [1, 1]} : vector<8x384xf32> to vector<8x128xf32>
    %9 = arith.negf %6 : vector<8x128xf32>
    %10 = math.exp %9 : vector<8x128xf32>
    %cst_5 = arith.constant 1.000000e+00 : f32
    %11 = vector.broadcast %cst_5 : f32 to vector<8x128xf32>
    %12 = arith.addf %11, %10 : vector<8x128xf32>
    %13 = arith.divf %11, %12 : vector<8x128xf32>
    %14 = math.tanh %7 : vector<8x128xf32>
    %15 = arith.mulf %13, %14 : vector<8x128xf32>
    %16 = arith.negf %8 : vector<8x128xf32>
    %17 = math.exp %16 : vector<8x128xf32>
    %cst_6 = arith.constant 1.000000e+00 : f32
    %18 = vector.broadcast %cst_6 : f32 to vector<8x128xf32>
    %19 = arith.addf %18, %17 : vector<8x128xf32>
    %20 = arith.divf %18, %19 : vector<8x128xf32>
    %21 = math.tanh %15 : vector<8x128xf32>
    %22 = arith.mulf %20, %21 : vector<8x128xf32>
    %c0_7 = arith.constant 0 : index
    %c0_8 = arith.constant 0 : index
    %23 = vector.load %arg6[%c0_7, %c0_8] : memref<8x256xf32, #tpu.memory_space<vmem>>, vector<8x128xf32>
    tpu.vector_store %arg6[%c0_7, %c0_8], %22 {strides = array<i32>} : memref<8x256xf32, #tpu.memory_space<vmem>>, vector<8x128xf32>,
    %24 = arith.truncf %22 : vector<8x128xf32> to vector<8x128xbf16>
    %c0_9 = arith.constant 0 : index
    %c0_10 = arith.constant 0 : index
    %25 = vector.load %arg4[%c0_9, %c0_10] : memref<128x384xbf16, #tpu.memory_space<vmem>>, vector<128x384xbf16>
    %cst_11 = arith.constant dense<0.000000e+00> : vector<8x384xf32>
    %26 = tpu.matmul %24, %25, %cst_11 {dimension_numbers = #tpu.dot_dimension_numbers<[1], [0], [0], [1], [0, 0, 1, 1], [], []>} : vector<8x128xbf16>, vector<128x384xbf16>, vector<8x384xf32> -> vector<8x384xf32>
    %c0_12 = arith.constant 0 : index
    %c0_13 = arith.constant 0 : index
    %27 = vector.load %arg5[%c0_12, %c0_13] : memref<1x384xf32, #tpu.memory_space<vmem>>, vector<1x384xf32>
    %28 = vector.broadcast %27 : vector<1x384xf32> to vector<8x384xf32>
    %29 = arith.addf %26, %28 : vector<8x384xf32>
    %30 = vector.extract_strided_slice %29 {offsets = [0, 0], sizes = [8, 128], strides = [1, 1]} : vector<8x384xf32> to vector<8x128xf32>
    %31 = vector.extract_strided_slice %29 {offsets = [0, 128], sizes = [8, 128], strides = [1, 1]} : vector<8x384xf32> to vector<8x128xf32>
    %32 = vector.extract_strided_slice %29 {offsets = [0, 256], sizes = [8, 128], strides = [1, 1]} : vector<8x384xf32> to vector<8x128xf32>
    %33 = arith.negf %30 : vector<8x128xf32>
    %34 = math.exp %33 : vector<8x128xf32>
    %cst_14 = arith.constant 1.000000e+00 : f32
    %35 = vector.broadcast %cst_14 : f32 to vector<8x128xf32>
    %36 = arith.addf %35, %34 : vector<8x128xf32>
    %37 = arith.divf %35, %36 : vector<8x128xf32>
    %38 = math.tanh %31 : vector<8x128xf32>
    %39 = arith.mulf %37, %38 : vector<8x128xf32>
    %40 = arith.negf %32 : vector<8x128xf32>
    %41 = math.exp %40 : vector<8x128xf32>
    %cst_15 = arith.constant 1.000000e+00 : f32
    %42 = vector.broadcast %cst_15 : f32 to vector<8x128xf32>
    %43 = arith.addf %42, %41 : vector<8x128xf32>
    %44 = arith.divf %42, %43 : vector<8x128xf32>
    %45 = math.tanh %39 : vector<8x128xf32>
    %46 = arith.mulf %44, %45 : vector<8x128xf32>
    %c0_16 = arith.constant 0 : index
    %c128 = arith.constant 128 : index
    %47 = vector.load %arg6[%c0_16, %c128] : memref<8x256xf32, #tpu.memory_space<vmem>>, vector<8x128xf32>
    tpu.vector_store %arg6[%c0_16, %c128], %46 {strides = array<i32>} : memref<8x256xf32, #tpu.memory_space<vmem>>, vector<8x128xf32>,
    return
  }
  func.func @transform_0(%arg0: i32) -> (i32, i32) {
    %c0_i32 = arith.constant 0 : i32
    %c0_i32_0 = arith.constant 0 : i32
    return %arg0, %c0_i32 : i32, i32
  }
  func.func @transform_1(%arg0: i32) -> (i32, i32) {
    %c0_i32 = arith.constant 0 : i32
    %c0_i32_0 = arith.constant 0 : i32
    %c0_i32_1 = arith.constant 0 : i32
    return %c0_i32, %c0_i32_0 : i32, i32
  }
  func.func @transform_2(%arg0: i32) -> (i32, i32) {
    %c0_i32 = arith.constant 0 : i32
    %c0_i32_0 = arith.constant 0 : i32
    %c0_i32_1 = arith.constant 0 : i32
    return %c0_i32, %c0_i32_0 : i32, i32
  }
  func.func @transform_3(%arg0: i32) -> (i32, i32) {
    %c0_i32 = arith.constant 0 : i32
    %c0_i32_0 = arith.constant 0 : i32
    %c0_i32_1 = arith.constant 0 : i32
    return %c0_i32, %c0_i32_0 : i32, i32
  }
  func.func @transform_4(%arg0: i32) -> (i32, i32) {
    %c0_i32 = arith.constant 0 : i32
    %c0_i32_0 = arith.constant 0 : i32
    %c0_i32_1 = arith.constant 0 : i32
    return %c0_i32, %c0_i32_0 : i32, i32
  }
  func.func @transform_5(%arg0: i32) -> (i32, i32) {
    %c0_i32 = arith.constant 0 : i32
    %c0_i32_0 = arith.constant 0 : i32
    return %arg0, %c0_i32 : i32, i32
  }
}

</mosaic_0001>

<bundles_post_ra>
// kernel: tpu_custom_call.1
= control target key start
LH: loop header
LB: loop body
LE: loop exit
PB: predicated region body
PF: predicated region fallthrough
CT: control target
= control target key end

     0   :  { %10 = vsyncpa [#allocation3], 0  ;;  %s869_s0 = inlined_call_operand.hbm [shape: bf16[8,32], index: 0, kind: input, shape index: {}]   ;;  %s870_s1 = inlined_call_operand.hbm [shape: bf16[32,384], index: 1, kind: input, shape index: {}]   ;;  %s871_s2 = inlined_call_operand.vmem [shape: f32[1,384], index: 2, kind: input, shape index: {}]   ;;  %s872_s3 = inlined_call_operand.hbm [shape: bf16[128,384], index: 3, kind: input, shape index: {}]   ;;  %s873_s4 = inlined_call_operand.vmem [shape: f32[1,384], index: 4, kind: input, shape index: {}]   ;;  %s874_s5 = inlined_call_operand.hbm [shape: f32[8,256], index: 5, kind: output, shape index: {}]  }
   0x1   :  { %11 = vsyncpa [#allocation6], 0 }
   0x2   :  { %12 = vsyncpa [#allocation4], 0  ;;  %s756_s18 = smov [#allocation5]   ;;  %s662_s22 = scalar_lea.hbm %s870_s1, 768 }
   0x3   :  { %s28_s19 = sshll.u32 %s756_s18, 4  ;;  %p663_p0 = scmp.ne.s32.totalorder %s870_s1, %s662_s22  ;;  %s29_s19 = int_to_ptr.vmem [resolvable:$true] %s28_s19 }
   0x4   :  { %p666_p1 = scmp.lt.u32.totalorder %s662_s22, %s870_s1 }
   0x6   :  { %p668_p2 = pnand %p666_p1, %p663_p0 }
   0x8   :  { %671 = shalt.err (!%p668_p2)
}
   0x9   :  { %s672_s27 = scalar_lea.vmem %s29_s19, 768  ;;  %p677_p4 = scmp.lt.s32.totalorder %s29_s19, %s29_s19 }
   0xa   :  { %p673_p3 = scmp.ne.s32.totalorder %s29_s19, %s672_s27  ;;  %p678_p5 = scmp.lt.s32.totalorder %s672_s27, %s672_s27 }
   0xc   :  { %p679_p6 = por %p678_p5, %p677_p4 }
   0xe   :  { %p680_p7 = pnand %p679_p6, %p673_p3 }
  0x10   :  { %683 = shalt.err (!%p680_p7)
}
  0x11   :  { %s757_s28 = smov 192   ;;  %s758_s29 = smov 12  }
  0x12   :  { %34 = dma.hbm_to_vmem [thread:$0]  %s870_s1, 768, %s29_s19, [#allocation6], %s757_s28, %s757_s28, %s758_s29  }
  0x13   :  { %s759_s7 = smov [#allocation2]   ;;  %s760_s9 = smov [#allocation7]  }
  0x14   :  { %s19_s8 = sshll.u32 %s759_s7, 4  ;;  %s42_s10 = sshll.u32 %s760_s9, 4  ;;  %s20_s8 = int_to_ptr.vmem [resolvable:$true] %s19_s8  ;;  %s43_s10 = int_to_ptr.vmem [resolvable:$true] %s42_s10 }
  0x15   :  { %s684_s13 = scalar_lea.hbm %s869_s0, 64 }
  0x16   :  { %p685_p8 = scmp.ne.s32.totalorder %s869_s0, %s684_s13  ;;  %p688_p9 = scmp.lt.u32.totalorder %s684_s13, %s869_s0 }
  0x18   :  { %p690_p10 = pnand %p688_p9, %p685_p8 }
  0x1a   :  { %693 = shalt.err (!%p690_p10)
}
  0x1b   :  { %s694_s1 = scalar_lea.vmem %s20_s8, 64  ;;  %p699_p12 = scmp.lt.s32.totalorder %s20_s8, %s20_s8 }
  0x1c   :  { %p695_p11 = scmp.ne.s32.totalorder %s20_s8, %s694_s1  ;;  %p700_p13 = scmp.lt.s32.totalorder %s694_s1, %s694_s1 }
  0x1e   :  { %p701_p0 = por %p700_p13, %p699_p12 }
  0x20   :  { %p702_p1 = pnand %p701_p0, %p695_p11 }
  0x22   :  { %705 = shalt.err (!%p702_p1)
}
  0x23   :  { %22 = dma.hbm_to_vmem [thread:$0]  %s869_s0, 64, %s20_s8, [#allocation3]  }
  0x24   :  { %s706_s22 = scalar_lea.hbm %s872_s3, 3072 }
  0x25   :  { %p707_p2 = scmp.ne.s32.totalorder %s872_s3, %s706_s22  ;;  %p710_p3 = scmp.lt.u32.totalorder %s706_s22, %s872_s3 }
  0x27   :  { %p712_p4 = pnand %p710_p3, %p707_p2 }
  0x29   :  { %715 = shalt.err (!%p712_p4)
}
  0x2a   :  { %s716_s27 = scalar_lea.vmem %s43_s10, 3072  ;;  %p721_p6 = scmp.lt.s32.totalorder %s43_s10, %s43_s10 }
  0x2b   :  { %p717_p5 = scmp.ne.s32.totalorder %s43_s10, %s716_s27  ;;  %p722_p7 = scmp.lt.s32.totalorder %s716_s27, %s716_s27 }
  0x2d   :  { %p723_p8 = por %p722_p7, %p721_p6 }
  0x2f   :  { %p724_p9 = pnand %p723_p8, %p717_p5 }
  0x31   :  { %727 = shalt.err (!%p724_p9)
}
  0x32   :  { %48 = dma.hbm_to_vmem [thread:$0]  %s872_s3, 3072, %s43_s10, [#allocation6], %s757_s28, %s757_s28, %s758_s29  }
  0x33   :  { %750 = dma.done.wait [#allocation3], 64  }
  0x34   :  { %751 = vsyncadd [#allocation3], 4294967232 }
  0x35   :  { %752 = dma.done.wait [#allocation6], 3840  }
  0x36   :  { %753 = vsyncadd [#allocation6], 4294963456  ;;  %v761_v0 = vmov 0   ;;  %v762_v1 = vmov 0.0   ;;  %vm763_vm0 = vmmov 0   ;;  %vm119_vm1 = vcmask 261120  }
  0x37   :  { %155 = vmatprep.mubr.bf16.mxu0 %v761_v0  ;;  %561 = vmatprep.subr.bf16.mxu1 %v762_v1  ;;  %v598_v2 = vld [vmem:[#allocation5 + $0x4] ss:$12 sps:$4 sm:$0xff]   ;;  %v600_v3 = vld [vmem:[#allocation5] ss:$12 sps:$4 sm:$0xff]   ;;  %v601_v4 = vld [vmem:[#allocation5 + $0x1c] ss:$12 sps:$4 sm:$0xff]   ;;  %v72_v33 = vlaneseq }
  0x38   :  { %565 = vmatprep.mubr.msk.bf16.mxu1 %vm763_vm0, %v762_v1  ;;  %123 = vmatprep.subr.bf16.mxu0 %v598_v2  ;;  %v603_v5 = vld [vmem:[#allocation5 + $0x18] ss:$12 sps:$4 sm:$0xff]   ;;  %v604_v6 = vld [vmem:[#allocation5 + $0x8] ss:$12 sps:$4 sm:$0xff]   ;;  %v61_v7 = vld [vmem:[#allocation2] sm:$0xf] }
  0x39   :  { %124 = vmatpush1.bf16.msra.mxu0 %v600_v3  ;;  %562 = vmatpush3.bf16.msra.mxu1 %v604_v6  ;;  %v605_v8 = vld [vmem:[#allocation5 + $0x20] ss:$12 sps:$4 sm:$0xff]   ;;  %v606_v10 = vld [vmem:[#allocation7] ss:$12 sps:$4 sm:$0xff]   ;;  %v609_v11 = vld [vmem:[#allocation7 + $0x8] ss:$12 sps:$4 sm:$0xff]  }
  0x3a   :  { %125 = vmatprep.subr.bf16.mxu0 %v601_v4  ;;  %563 = vmatprep.subr.bf16.mxu1 %v762_v1  ;;  %v608_v9 = vld [vmem:[#allocation7 + $0x4] ss:$12 sps:$4 sm:$0xff]   ;;  %v612_v12 = vld [vmem:[#allocation7 + $0x1c] ss:$12 sps:$4 sm:$0xff]   ;;  %v613_v14 = vld [vmem:[#allocation7 + $0x20] ss:$12 sps:$4 sm:$0xff]  }
  0x3b   :  { %v610_v13 = vld [vmem:[#allocation7 + $0x18] ss:$12 sps:$4 sm:$0xff]   ;;  %v616_v15 = vld [vmem:[#allocation7 + $0x34] ss:$12 sps:$4 sm:$0xff]   ;;  %v614_v16 = vld [vmem:[#allocation7 + $0x30] ss:$12 sps:$4 sm:$0xff]  }
  0x3c   :  { %v617_v17 = vld [vmem:[#allocation7 + $0x38] ss:$12 sps:$4 sm:$0xff]   ;;  %v618_v19 = vld [vmem:[#allocation7 + $0x48] ss:$12 sps:$4 sm:$0xff]   ;;  %v621_v20 = vld [vmem:[#allocation7 + $0x50] ss:$12 sps:$4 sm:$0xff]  }
  0x3d   :  { %126 = vmatpush1.bf16.msra.mxu0 %v603_v5  ;;  %564 = vmatpush3.bf16.msra.mxu1 %v605_v8  ;;  %v620_v18 = vld [vmem:[#allocation7 + $0x4c] ss:$12 sps:$4 sm:$0xff]   ;;  %v624_v21 = vld [vmem:[#allocation7 + $0x64] ss:$12 sps:$4 sm:$0xff]   ;;  %v625_v23 = vld [vmem:[#allocation7 + $0x68] ss:$12 sps:$4 sm:$0xff]  }
  0x3e   :  { %569 = vmatprep.subr.bf16.mxu1 %v762_v1  ;;  %399 = vmatprep.subr.bf16.mxu0 %v608_v9  ;;  %v622_v22 = vld [vmem:[#allocation7 + $0x60] ss:$12 sps:$4 sm:$0xff]   ;;  %v626_v24 = vld [vmem:[#allocation7 + $0x78] ss:$12 sps:$4 sm:$0xff]   ;;  %v628_v25 = vld [vmem:[#allocation7 + $0x7c] ss:$12 sps:$4 sm:$0xff]  }
  0x3f   :  { %v629_v26 = vld [vmem:[#allocation7 + $0x80] ss:$12 sps:$4 sm:$0xff]   ;;  %v630_v28 = vld [vmem:[#allocation7 + $0x90] ss:$12 sps:$4 sm:$0xff]   ;;  %v633_v29 = vld [vmem:[#allocation7 + $0x98] ss:$12 sps:$4 sm:$0xff]  }
  0x40   :  { %519 = vmatmul.mubr.msk.bf16.vlgmr.msra.gmra.mrb[0].mxu0 %vm119_vm1, %v61_v7  ;;  %566 = vmatmul.mubr.msk.bf16.vlgmr.msra.gmra.mrb[0].mxu1 %vm119_vm1, %v61_v7  ;;  %v632_v27 = vld [vmem:[#allocation7 + $0x94] ss:$12 sps:$4 sm:$0xff]   ;;  %v636_v30 = vld [vmem:[#allocation7 + $0xac] ss:$12 sps:$4 sm:$0xff]   ;;  %v637_v32 = vld [vmem:[#allocation7 + $0xb0] ss:$12 sps:$4 sm:$0xff]  }
  0x41   :  { %431 = vmatprep.mubr.bf16.mxu0 %v761_v0  ;;  %585 = vmatprep.mubr.msk.bf16.mxu1 %vm763_vm0, %v762_v1  ;;  %v634_v31 = vld [vmem:[#allocation7 + $0xa8] ss:$12 sps:$4 sm:$0xff]   ;;  %v73_v34 = vshrl.u32 %v72_v33, 7  ;;  %v70_v36 = vld [vmem:[%s871_s2] sm:$0x7] }
  0x42   :  { %400 = vmatpush1.bf16.msra.mxu0 %v606_v10  ;;  %570 = vmatpush3.bf16.msra.mxu1 %v609_v11  ;;  %v254_v2 = vld [vmem:[%s873_s4] sm:$0x7]  ;;  %s764_s4 = smov [#allocation8]  }
  0x43   :  { %571 = vmatprep.subr.bf16.mxu1 %v762_v1  ;;  %401 = vmatprep.subr.bf16.mxu0 %v612_v12  ;;  %v74_v35 = vsub.s32 0, %v73_v34  ;;  %v82_v37 = vsub.s32 2, %v73_v34  ;;  %v78_v50 = vsub.s32 1, %v73_v34  ;;  %s503_s6 = sshll.u32 %s764_s4, 4  ;;  %s504_s6 = int_to_ptr.vmem [resolvable:$true] %s503_s6 }
  0x44   :  { %s728_s7 = scalar_lea.vmem %s504_s6, 256  ;;  %p733_p11 = scmp.lt.s32.totalorder %s504_s6, %s504_s6 }
  0x45   :  { %v75_v38 = vrot.slane %v70_v36, %v74_v35  ;;  %v83_v40 = vrot.slane %v70_v36, %v82_v37  ;;  %v79_v53 = vrot.slane %v70_v36, %v78_v50  ;;  %v259_v3 = vrot.slane %v254_v2, %v74_v35  ;;  %p729_p10 = scmp.ne.s32.totalorder %s504_s6, %s728_s7  ;;  %p734_p12 = scmp.lt.s32.totalorder %s728_s7, %s728_s7 }
  0x46   :  { %402 = vmatpush1.bf16.msra.mxu0 %v610_v13  ;;  %572 = vmatpush3.bf16.msra.mxu1 %v613_v14  ;;  %v267_v7 = vrot.slane %v254_v2, %v82_v37 }
  0x47   :  { %573 = vmatprep.subr.bf16.mxu1 %v762_v1  ;;  %403 = vmatprep.subr.bf16.mxu0 %v616_v15  ;;  %p735_p13 = por %p734_p12, %p733_p11 }
  0x49   :  { %p736_p0 = pnand %p735_p13, %p729_p10 }
  0x4a   :  { %404 = vmatpush1.bf16.msra.mxu0 %v614_v16  ;;  %574 = vmatpush3.bf16.msra.mxu1 %v617_v17  ;;  %v263_v17 = vrot.slane %v254_v2, %v78_v50 }
  0x4b   :  { %575 = vmatprep.subr.bf16.mxu1 %v762_v1  ;;  %405 = vmatprep.subr.bf16.mxu0 %v620_v18 }
  0x4e   :  { %406 = vmatpush1.bf16.msra.mxu0 %v618_v19  ;;  %576 = vmatpush3.bf16.msra.mxu1 %v621_v20 }
  0x4f   :  { %577 = vmatprep.subr.bf16.mxu1 %v762_v1  ;;  %407 = vmatprep.subr.bf16.mxu0 %v624_v21 }
  0x52   :  { %408 = vmatpush1.bf16.msra.mxu0 %v622_v22  ;;  %578 = vmatpush3.bf16.msra.mxu1 %v625_v23 }
  0x53   :  { %579 = vmatprep.subr.bf16.mxu1 %v762_v1  ;;  %409 = vmatprep.subr.bf16.mxu0 %v628_v25 }
  0x56   :  { %410 = vmatpush1.bf16.msra.mxu0 %v626_v24  ;;  %580 = vmatpush3.bf16.msra.mxu1 %v629_v26 }
  0x57   :  { %411 = vmatprep.subr.bf16.mxu0 %v632_v27  ;;  %581 = vmatprep.subr.bf16.mxu1 %v762_v1 }
  0x5a   :  { %412 = vmatpush1.bf16.msra.mxu0 %v630_v28  ;;  %582 = vmatpush3.bf16.msra.mxu1 %v633_v29 }
  0x5b   :  { %413 = vmatprep.subr.bf16.mxu0 %v636_v30  ;;  %583 = vmatprep.subr.bf16.mxu1 %v762_v1 }
  0x5e   :  { %414 = vmatpush1.bf16.msra.mxu0 %v634_v31  ;;  %584 = vmatpush3.bf16.msra.mxu1 %v637_v32 }
 0x113   :  { %v157_v39 = vpop.f32.mrb[0].mxu0  ;;  %v198_v44 = vpop.f32.mrb[0].mxu1 }
 0x114   :  { %v158_v41 = vadd.f32 %v157_v39, %v75_v38  ;;  %v159_v42 = vpop.f32.mrb[1].mxu0  ;;  %v567_v47 = vpop.f32.mrb[1].mxu1  ;;  %v199_v48 = vadd.f32 %v198_v44, %v83_v40 }
 0x115   :  { %v161_v43 = vpop.f32.mrb[2].mxu0  ;;  %v201_v49 = vpop.f32.mrb[2].mxu1  ;;  %v160_v54 = vadd.f32 %v159_v42, %v79_v53 }
 0x116   :  { %v521_v45 = vmul.f32 -1.442695, %v158_v41  ;;  %v162_v46 = vpop.f32.mrb[3].mxu0  ;;  %v568_v51 = vpop.f32.mrb[3].mxu1  ;;  %v522_v52 = vmul.f32 -1.442695, %v199_v48 }
 0x118   :  { %638 = vpow2.f32 %v521_v45 }
 0x119   :  { %640 = vpow2.f32 %v522_v52 }
 0x11a   :  { %642 = vtanh.f32 %v160_v54 }
 0x122   :  { %v639_v55 = vpop.eup %638 }
 0x123   :  { %v207_v56 = vadd.f32 1.0, %v639_v55  ;;  %v641_v57 = vpop.eup %640 }
 0x124   :  { %v215_v58 = vadd.f32 1.0, %v641_v57  ;;  %v643_v59 = vpop.eup %642 }
 0x125   :  { %644 = vrcp.f32 %v207_v56 }
 0x126   :  { %646 = vrcp.f32 %v215_v58 }
 0x12f   :  { %v645_v60 = vpop.eup %644 }
 0x130   :  { %v211_v61 = vmul.f32 %v645_v60, %v643_v59  ;;  %v647_v62 = vpop.eup %646 }
 0x132   :  { %648 = vtanh.f32 %v211_v61 }
 0x13c   :  { %v649_v63 = vpop.eup %648 }
 0x13d   :  { %v219_v0 = vmul.f32 %v649_v63, %v647_v62 }
 0x13f   :  { %v221_v1 = vpack.c.bf16 %v219_v0, %v219_v0  ;;  %220 = vst [vmem:[#allocation8] sm:$0xff] %v219_v0 }
 0x141   :  { %432 = vmatmul.mubr.bf16.vlgmr.msra.gmra.mrb[4].mxu0 %v221_v1  ;;  %586 = vmatmul.mubr.bf16.vlgmr.msra.gmra.mrb[4].mxu1 %v221_v1 }
 0x214   :  { %v433_v4 = vpop.f32.mrb[4].mxu0  ;;  %v474_v5 = vpop.f32.mrb[4].mxu1 }
 0x215   :  { %v434_v6 = vadd.f32 %v433_v4, %v259_v3  ;;  %v435_v8 = vpop.f32.mrb[5].mxu0  ;;  %v587_v9 = vpop.f32.mrb[5].mxu1  ;;  %v475_v15 = vadd.f32 %v474_v5, %v267_v7 }
 0x216   :  { %v437_v10 = vpop.f32.mrb[6].mxu0  ;;  %v477_v11 = vpop.f32.mrb[6].mxu1  ;;  %v436_v18 = vadd.f32 %v435_v8, %v263_v17 }
 0x217   :  { %v547_v12 = vmul.f32 -1.442695, %v434_v6  ;;  %v438_v13 = vpop.f32.mrb[7].mxu0  ;;  %v588_v14 = vpop.f32.mrb[7].mxu1  ;;  %v548_v16 = vmul.f32 -1.442695, %v475_v15 }
 0x219   :  { %650 = vpow2.f32 %v547_v12 }
 0x21a   :  { %652 = vpow2.f32 %v548_v16 }
 0x21b   :  { %654 = vtanh.f32 %v436_v18 }
 0x223   :  { %v651_v19 = vpop.eup %650 }
 0x224   :  { %v483_v20 = vadd.f32 1.0, %v651_v19  ;;  %v653_v21 = vpop.eup %652 }
 0x225   :  { %v491_v22 = vadd.f32 1.0, %v653_v21  ;;  %v655_v23 = vpop.eup %654 }
 0x226   :  { %656 = vrcp.f32 %v483_v20 }
 0x227   :  { %658 = vrcp.f32 %v491_v22 }
 0x230   :  { %v657_v24 = vpop.eup %656 }
 0x231   :  { %v487_v25 = vmul.f32 %v657_v24, %v655_v23  ;;  %v659_v26 = vpop.eup %658 }
 0x233   :  { %660 = vtanh.f32 %v487_v25 }
 0x23d   :  { %v661_v27 = vpop.eup %660 }
 0x23e   :  { %v495_v28 = vmul.f32 %v661_v27, %v659_v26 }
 0x240   :  { %496 = vst [vmem:[#allocation8 + $0x8] sm:$0xff] %v495_v28 }
 0x241   :  { %739 = shalt.err (!%p736_p0)
}
 0x242   :  { %s740_s10 = scalar_lea.hbm %s874_s5, 256 }
 0x243   :  { %p741_p1 = scmp.ne.s32.totalorder %s874_s5, %s740_s10  ;;  %p744_p2 = scmp.lt.u32.totalorder %s740_s10, %s874_s5 }
 0x245   :  { %p746_p3 = pnand %p744_p2, %p741_p1 }
 0x247   :  { %749 = shalt.err (!%p746_p3)
}
 0x248   :  { %506 = dma.vmem_to_hbm [thread:$0]  %s504_s6, 256, %s874_s5, [#allocation4]  }
 0x249   :  { %754 = dma.done.wait [#allocation4], 256  }
 0x24a   :  { %755 = vsyncadd [#allocation4], 4294967040 }
 0x24b   :  { %510 = vsyncpa [#allocation3], 1 }
 0x24c   :  { %511 = vsyncpa [#allocation6], 1 }
 0x24d   :  { %512 = vsyncpa [#allocation4], 1 }

</bundles_post_ra>
